<compile_context>
chip_gen: v5e
topology: v5e:2x2
jax: 0.10.0
libtpu: 0.0.40
codegen_flags: <defaults>
</compile_context>

<pallas_src>
import functools

import jax
import jax.numpy as jnp
from jax.experimental import pallas as pl
from jax.experimental.pallas import tpu as pltpu  # noqa: F401  (imported per convention)

# ---- small shapes consistent with the module ----
B = 2            # batch
N = 8            # sequence length
DIM = 32         # model dim
HIDDEN = 128     # ffn hidden dim (lane-dense: multiple of 128)

_GELU_C = 0.7978845608028654  # sqrt(2/pi)


def ffn_kernel(x_ref, w1_ref, w2_ref, bias_ref, out_ref):
    """Single-step kernel. x_ref: (B*N, DIM); w1_ref: (DIM, HIDDEN);
    w2_ref: (HIDDEN, DIM); bias_ref: (2, HIDDEN) [row 0 = b1, row 1[:DIM] = b2]."""
    x = x_ref[...]                                                       # (BN, DIM)

    # Linear 1 (MXU) + bias
    h = jnp.dot(x, w1_ref[...], preferred_element_type=jnp.float32)     # (BN, HIDDEN)
    h = h + bias_ref[0:1, :]

    # GELU (tanh form; EUP tanh, VPU elementwise).
    # TODO(synk): nn.GELU() defaults to the exact erf form; the tanh approximation
    # is used here for portable Mosaic lowering (max abs deviation ~1e-3).
    g = 0.5 * h * (1.0 + jnp.tanh(_GELU_C * (h + 0.044715 * h * h * h)))

    # Linear 2 (MXU) + bias
    out = jnp.dot(g, w2_ref[...], preferred_element_type=jnp.float32)   # (BN, DIM)
    out_ref[...] = out + bias_ref[1:2, :DIM]


@jax.jit
def ffn_pallas(x, w1_t, b1, w2_t, b2):
    """x: (B, N, DIM); w1_t: (DIM, HIDDEN); b1: (HIDDEN,); w2_t: (HIDDEN, DIM); b2: (DIM,)."""
    b, n, d = x.shape
    hid = w1_t.shape[1]
    bn = b * n

    x2 = x.reshape(bn, d)
    # Coalesce the two bias vectors into one parameter slab (row 1 is zero-padded).
    bias_pack = jnp.zeros((2, hid), x.dtype).at[0, :].set(b1).at[1, :d].set(b2)

    out = pl.pallas_call(
        ffn_kernel,
        out_shape=jax.ShapeDtypeStruct((bn, d), jnp.float32),
        in_specs=[
            pl.BlockSpec((bn, d), lambda: (0, 0)),    # x (flattened rows)
            pl.BlockSpec((d, hid), lambda: (0, 0)),   # W1^T
            pl.BlockSpec((hid, d), lambda: (0, 0)),   # W2^T
            pl.BlockSpec((2, hid), lambda: (0, 0)),   # packed biases
        ],
        out_specs=pl.BlockSpec((bn, d), lambda: (0, 0)),
    )(x2, w1_t, w2_t, bias_pack)

    return out.reshape(b, n, d)


def ffn_reference(x, w1, b1, w2, b2):
    """Pure-JAX mirror of the PyTorch forward (eval mode, dropout = 0)."""
    h = x @ w1.T + b1
    g = 0.5 * h * (1.0 + jnp.tanh(_GELU_C * (h + 0.044715 * h ** 3)))
    return g @ w2.T + b2


if __name__ == "__main__":
    key = jax.random.PRNGKey(0)
    kx, k1, k2, k3, k4 = jax.random.split(key, 5)

    x = jax.random.normal(kx, (B, N, DIM), dtype=jnp.float32)

    # PyTorch-style uniform init bounds.
    lim1 = 1.0 / (DIM ** 0.5)
    lim2 = 1.0 / (HIDDEN ** 0.5)
    w1 = jax.random.uniform(k1, (HIDDEN, DIM), jnp.float32, -lim1, lim1)   # Linear(dim, hidden).weight
    b1 = jax.random.uniform(k2, (HIDDEN,), jnp.float32, -lim1, lim1)
    w2 = jax.random.uniform(k3, (DIM, HIDDEN), jnp.float32, -lim2, lim2)   # Linear(hidden, dim).weight
    b2 = jax.random.uniform(k4, (DIM,), jnp.float32, -lim2, lim2)

    out = ffn_pallas(x, w1.T, b1, w2.T, b2)
    out = jax.block_until_ready(out)

    ref = ffn_reference(x, w1, b1, w2, b2)
    assert out.shape == (B, N, DIM)
    assert jnp.allclose(out, ref, rtol=1e-4, atol=1e-4), \
        f"max abs diff {jnp.max(jnp.abs(out - ref))}"
    print("KERNEL_OK")
</pallas_src>

<mosaic_0001>
module attributes {stable_mosaic.version = 11 : i64} {
  func.func @ffn_kernel(%arg0: memref<16x32xf32, #tpu.memory_space<vmem>>, %arg1: memref<32x128xf32, #tpu.memory_space<vmem>>, %arg2: memref<128x32xf32, #tpu.memory_space<vmem>>, %arg3: memref<2x128xf32, #tpu.memory_space<vmem>>, %arg4: memref<16x32xf32, #tpu.memory_space<vmem>>) attributes {dimension_semantics = [], scalar_prefetch = 0 : i64, scratch_operands = 0 : i64, tpu.core_type = #tpu.core_type<tc>} {
    %c0 = arith.constant 0 : index
    %c0_0 = arith.constant 0 : index
    %0 = vector.load %arg0[%c0, %c0_0] : memref<16x32xf32, #tpu.memory_space<vmem>>, vector<16x32xf32>
    %c0_1 = arith.constant 0 : index
    %c0_2 = arith.constant 0 : index
    %1 = vector.load %arg1[%c0_1, %c0_2] : memref<32x128xf32, #tpu.memory_space<vmem>>, vector<32x128xf32>
    %cst = arith.constant dense<0.000000e+00> : vector<16x128xf32>
    %2 = tpu.matmul %0, %1, %cst {dimension_numbers = #tpu.dot_dimension_numbers<[1], [0], [0], [1], [0, 0, 1, 1], [], []>} : vector<16x32xf32>, vector<32x128xf32>, vector<16x128xf32> -> vector<16x128xf32>
    %c0_3 = arith.constant 0 : index
    %c0_4 = arith.constant 0 : index
    %3 = vector.load %arg3[%c0_3, %c0_4] : memref<2x128xf32, #tpu.memory_space<vmem>>, vector<1x128xf32>
    %4 = vector.broadcast %3 : vector<1x128xf32> to vector<16x128xf32>
    %5 = arith.addf %2, %4 : vector<16x128xf32>
    %cst_5 = arith.constant 5.000000e-01 : f32
    %6 = vector.broadcast %cst_5 : f32 to vector<16x128xf32>
    %7 = arith.mulf %6, %5 : vector<16x128xf32>
    %cst_6 = arith.constant 4.471500e-02 : f32
    %8 = vector.broadcast %cst_6 : f32 to vector<16x128xf32>
    %9 = arith.mulf %8, %5 : vector<16x128xf32>
    %10 = arith.mulf %9, %5 : vector<16x128xf32>
    %11 = arith.mulf %10, %5 : vector<16x128xf32>
    %12 = arith.addf %5, %11 : vector<16x128xf32>
    %cst_7 = arith.constant 0.797884583 : f32
    %13 = vector.broadcast %cst_7 : f32 to vector<16x128xf32>
    %14 = arith.mulf %13, %12 : vector<16x128xf32>
    %15 = math.tanh %14 : vector<16x128xf32>
    %cst_8 = arith.constant 1.000000e+00 : f32
    %16 = vector.broadcast %cst_8 : f32 to vector<16x128xf32>
    %17 = arith.addf %16, %15 : vector<16x128xf32>
    %18 = arith.mulf %7, %17 : vector<16x128xf32>
    %c0_9 = arith.constant 0 : index
    %c0_10 = arith.constant 0 : index
    %19 = vector.load %arg2[%c0_9, %c0_10] : memref<128x32xf32, #tpu.memory_space<vmem>>, vector<128x32xf32>
    %cst_11 = arith.constant dense<0.000000e+00> : vector<16x32xf32>
    %20 = tpu.matmul %18, %19, %cst_11 {dimension_numbers = #tpu.dot_dimension_numbers<[1], [0], [0], [1], [0, 0, 1, 1], [], []>} : vector<16x128xf32>, vector<128x32xf32>, vector<16x32xf32> -> vector<16x32xf32>
    %c1 = arith.constant 1 : index
    %c0_12 = arith.constant 0 : index
    %21 = vector.load %arg3[%c1, %c0_12] : memref<2x128xf32, #tpu.memory_space<vmem>>, vector<1x32xf32>
    %22 = vector.broadcast %21 : vector<1x32xf32> to vector<16x32xf32>
    %23 = arith.addf %20, %22 : vector<16x32xf32>
    %c0_13 = arith.constant 0 : index
    %c0_14 = arith.constant 0 : index
    %24 = vector.load %arg4[%c0_13, %c0_14] : memref<16x32xf32, #tpu.memory_space<vmem>>, vector<16x32xf32>
    tpu.vector_store %arg4[%c0_13, %c0_14], %23 {strides = array<i32>} : memref<16x32xf32, #tpu.memory_space<vmem>>, vector<16x32xf32>,
    return
  }
}

</mosaic_0001>

<bundles_post_ra>
// kernel: ffn_pallas.1
= control target key start
LH: loop header
LB: loop body
LE: loop exit
PB: predicated region body
PF: predicated region fallthrough
CT: control target
= control target key end

     0   :  { %s295_s0 = inlined_call_operand.vmem [shape: f32[16,32], index: 0, kind: input, shape index: {}]   ;;  %s296_s1 = inlined_call_operand.vmem [shape: f32[32,128], index: 1, kind: input, shape index: {}]   ;;  %s297_s2 = inlined_call_operand.vmem [shape: f32[128,32], index: 2, kind: input, shape index: {}]   ;;  %s298_s3 = inlined_call_operand.vmem [shape: f32[2,128], index: 3, kind: input, shape index: {}]   ;;  %s299_s4 = inlined_call_operand.hbm [shape: f32[16,32], index: 4, kind: output, shape index: {}]  }
   0x1   :  { %v23_v0 = vld [vmem:[%s296_s1 + $0x18] sm:$0xff]  ;;  %v22_v1 = vld [vmem:[%s296_s1 + $0x10] sm:$0xff]  ;;  %v21_v2 = vld [vmem:[%s296_s1 + $0x8] sm:$0xff] }
   0x2   :  { %45 = vmatpush.msra.mxu0 %v23_v0  ;;  %v89_v3 = vld [vmem:[%s297_s2 + $0x78] sm:$0xff]  ;;  %v88_v4 = vld [vmem:[%s297_s2 + $0x70] sm:$0xff]  ;;  %v20_v5 = vld [vmem:[%s296_s1] sm:$0xff] }
   0x3   :  { %92 = vmatpush.msra.mxu1 %v89_v3  ;;  %v87_v6 = vld [vmem:[%s297_s2 + $0x68] sm:$0xff]  ;;  %137 = vmatpush.msra.mxu2 %v89_v3 }
   0x4   :  { %46 = vmatpush.msra.mxu0 %v22_v1 }
   0x5   :  { %9 = vsyncpa [#allocation3], 0  ;;  %v18_v7 = vld [vmem:[%s295_s0] sm:$0xff]  ;;  %vm26_vm0 = vcmask 261120   ;;  %93 = vmatpush.msra.mxu1 %v88_v4  ;;  %138 = vmatpush.msra.mxu2 %v88_v4  ;;  %v19_v9 = vld [vmem:[%s295_s0 + $0x8] sm:$0xff]  ;;  %s188_s7 = smov [#allocation2]  }
   0x6   :  { %47 = vmatpush.msra.mxu0 %v21_v2  ;;  %v86_v8 = vld [vmem:[%s297_s2 + $0x60] sm:$0xff]  ;;  %v85_v10 = vld [vmem:[%s297_s2 + $0x58] sm:$0xff]  ;;  %v84_v11 = vld [vmem:[%s297_s2 + $0x50] sm:$0xff]  ;;  %s121_s8 = sshll.u32 %s188_s7, 4  ;;  %s123_s11 = sshll.u32 %s299_s4, 4  ;;  %s122_s8 = int_to_ptr.vmem [resolvable:$true] %s121_s8  ;;  %s124_s11 = int_to_ptr.hbm [resolvable:$true] %s123_s11 }
   0x7   :  { %94 = vmatpush.msra.mxu1 %v87_v6  ;;  %139 = vmatpush.msra.mxu2 %v87_v6  ;;  %v83_v12 = vld [vmem:[%s297_s2 + $0x48] sm:$0xff]  ;;  %v82_v13 = vld [vmem:[%s297_s2 + $0x40] sm:$0xff]  ;;  %v81_v14 = vld [vmem:[%s297_s2 + $0x38] sm:$0xff]  ;;  %s189_s12 = smov 128   ;;  %s190_s13 = smov 8  }
   0x8   :  { %48 = vmatpush.msra.mxu0 %v20_v5  ;;  %v80_v15 = vld [vmem:[%s297_s2 + $0x30] sm:$0xff]  ;;  %v79_v16 = vld [vmem:[%s297_s2 + $0x28] sm:$0xff]  ;;  %v78_v17 = vld [vmem:[%s297_s2 + $0x20] sm:$0xff] }
   0x9   :  { %135 = vmatmul.msk.f32.vlgmr.msra.gmra.mxu0 %vm26_vm0, %v18_v7  ;;  %95 = vmatpush.msra.mxu1 %v86_v8  ;;  %v77_v18 = vld [vmem:[%s297_s2 + $0x18] sm:$0xff]  ;;  %v76_v19 = vld [vmem:[%s297_s2 + $0x10] sm:$0xff]  ;;  %v75_v20 = vld [vmem:[%s297_s2 + $0x8] sm:$0xff] }
   0xa   :  { %140 = vmatpush.msra.mxu2 %v86_v8  ;;  %v74_v21 = vld [vmem:[%s297_s2] sm:$0xff] }
   0xb   :  { %96 = vmatpush.msra.mxu1 %v85_v10  ;;  %v156_v22 = vld [vmem:[%s298_s3] ss:$0 sm:$0xff]  ;;  %v157_v45 = vld [vmem:[%s298_s3 + $0x1] ss:$0 sm:$0xff] }
   0xc   :  { %141 = vmatpush.msra.mxu2 %v85_v10 }
   0xd   :  { %97 = vmatpush.msra.mxu1 %v84_v11 }
   0xe   :  { %142 = vmatpush.msra.mxu2 %v84_v11 }
   0xf   :  { %98 = vmatpush.msra.mxu1 %v83_v12 }
  0x10   :  { %143 = vmatpush.msra.mxu2 %v83_v12 }
  0x11   :  { %136 = vmatmul.msk.f32.gmra.mxu0 %vm26_vm0, %v19_v9  ;;  %99 = vmatpush.msra.mxu1 %v82_v13 }
  0x12   :  { %144 = vmatpush.msra.mxu2 %v82_v13 }
  0x13   :  { %100 = vmatpush.msra.mxu1 %v81_v14 }
  0x14   :  { %145 = vmatpush.msra.mxu2 %v81_v14 }
  0x15   :  { %101 = vmatpush.msra.mxu1 %v80_v15 }
  0x16   :  { %146 = vmatpush.msra.mxu2 %v80_v15 }
  0x17   :  { %102 = vmatpush.msra.mxu1 %v79_v16 }
  0x18   :  { %147 = vmatpush.msra.mxu2 %v79_v16 }
  0x19   :  { %103 = vmatpush.msra.mxu1 %v78_v17 }
  0x1a   :  { %148 = vmatpush.msra.mxu2 %v78_v17 }
  0x1b   :  { %104 = vmatpush.msra.mxu1 %v77_v18 }
  0x1c   :  { %149 = vmatpush.msra.mxu2 %v77_v18 }
  0x1d   :  { %105 = vmatpush.msra.mxu1 %v76_v19 }
  0x1e   :  { %150 = vmatpush.msra.mxu2 %v76_v19 }
  0x1f   :  { %106 = vmatpush.msra.mxu1 %v75_v20 }
  0x20   :  { %151 = vmatpush.msra.mxu2 %v75_v20 }
  0x21   :  { %107 = vmatpush.msra.mxu1 %v74_v21 }
  0x22   :  { %152 = vmatpush.msra.mxu2 %v74_v21 }
  0x86   :  { %v50_v23 = vpop.f32.mrf.mxu0 }
  0x87   :  { %v51_v24 = vadd.f32 %v156_v22, %v50_v23 }
  0x89   :  { %v58_v25 = vmul.f32 0.044715, %v51_v24  ;;  %v56_v38 = vmul.f32 0.5, %v51_v24 }
  0x8b   :  { %v60_v26 = vmul.f32 %v58_v25, %v51_v24 }
  0x8d   :  { %v62_v27 = vmul.f32 %v60_v26, %v51_v24 }
  0x8e   :  { %v53_v28 = vpop.f32.mrf.mxu0 }
  0x8f   :  { %v54_v29 = vadd.f32 %v156_v22, %v53_v28  ;;  %v64_v30 = vadd.f32 %v62_v27, %v51_v24 }
  0x91   :  { %v66_v31 = vmul.f32 0.7978846, %v64_v30  ;;  %v59_v32 = vmul.f32 0.044715, %v54_v29  ;;  %v57_v42 = vmul.f32 0.5, %v54_v29 }
  0x93   :  { %158 = vtanh.f32 %v66_v31  ;;  %v61_v33 = vmul.f32 %v59_v32, %v54_v29 }
  0x95   :  { %v63_v34 = vmul.f32 %v61_v33, %v54_v29 }
  0x97   :  { %v65_v35 = vadd.f32 %v63_v34, %v54_v29 }
  0x99   :  { %v159_v36 = vpop.eup %158  ;;  %v67_v37 = vmul.f32 0.7978846, %v65_v35 }
  0x9a   :  { %v70_v39 = vadd.f32 1.0, %v159_v36 }
  0x9b   :  { %160 = vtanh.f32 %v67_v37 }
  0x9c   :  { %v72_v40 = vmul.f32 %v70_v39, %v56_v38 }
  0x9e   :  { %108 = vmatmul.f32.vlgmr.msra.gmra.mxu1 %v72_v40 }
  0xa1   :  { %v161_v41 = vpop.eup %160 }
  0xa2   :  { %v71_v43 = vadd.f32 1.0, %v161_v41 }
  0xa4   :  { %v73_v44 = vmul.f32 %v71_v43, %v57_v42 }
  0xa6   :  { %111 = vmatmul.f32.vlgmr.msra.gmra.mxu2 %v73_v44 }
 0x11b   :  { %v109_v46 = vpop.f32.mrf.mxu1 }
 0x11c   :  { %v110_v47 = vadd.f32 %v157_v45, %v109_v46 }
 0x11e   :  { %115 = vst.msk [vmem:[#allocation2] sm:$0xff] %vm26_vm0, %v110_v47 }
 0x129   :  { %v112_v48 = vpop.f32.mrf.mxu2 }
 0x12a   :  { %v113_v49 = vadd.f32 %v157_v45, %v112_v48 }
 0x12c   :  { %116 = vst.msk [vmem:[#allocation2 + $0x8] sm:$0xff] %vm26_vm0, %v113_v49 }
 0x12d   :  { %129 = dma.vmem_to_hbm [thread:$0]  %s122_s8, 256, %s124_s11, [#allocation3], %s189_s12, %s189_s12, %s190_s13  }
 0x12e   :  { %186 = dma.done.wait [#allocation3], 256  }
 0x12f   :  { %187 = vsyncadd [#allocation3], 4294967040 }
 0x130   :  { %134 = vsyncpa [#allocation3], 1 }

</bundles_post_ra>
